<compile_context>
chip_gen: v7x
topology: tpu7x:2x2x1
jax: 0.10.0
libtpu: 0.0.40
codegen_flags: <defaults>
</compile_context>

<pallas_src>
import jax
import jax.numpy as jnp
from jax.experimental import pallas as pl
from jax.experimental.pallas import tpu as pltpu


def _round_up(n, m):
    return ((n + m - 1) // m) * m


def _cdiv(a, b):
    return -(-a // b)


# ---------------------------------------------------------------------------
# Kernel
# ---------------------------------------------------------------------------
def _dqn_kernel(x_ref,
                w1_ref, b1_ref,
                w2_ref, b2_ref,
                w3_ref, b3_ref,
                w4_ref, b4_ref,
                o_ref):
    """One batch tile of the whole forward pass.

    x_ref:  (TM, state_dim)  f32/bf16  -> cast once to bf16 for the MXU
    wN_ref: (in, out)        bf16      (VMEM-resident across all grid steps)
    bN_ref: (1, out)         f32
    o_ref:  (TM, n_actions)  f32       (unpadded head)
    """
    x = x_ref[...].astype(jnp.bfloat16)   # no-op if x already bf16

    h = jnp.dot(x, w1_ref[...], preferred_element_type=jnp.float32) + b1_ref[...]
    h = jnp.maximum(h, 0.0).astype(jnp.bfloat16)

    h = jnp.dot(h, w2_ref[...], preferred_element_type=jnp.float32) + b2_ref[...]
    h = jnp.maximum(h, 0.0).astype(jnp.bfloat16)

    h = jnp.dot(h, w3_ref[...], preferred_element_type=jnp.float32) + b3_ref[...]
    h = jnp.maximum(h, 0.0).astype(jnp.bfloat16)

    o_ref[...] = (jnp.dot(h, w4_ref[...], preferred_element_type=jnp.float32)
                  + b4_ref[...])


# ---------------------------------------------------------------------------
# One-time parameter preparation (hoisted out of the per-step forward path)
# ---------------------------------------------------------------------------
def prepare_dqn_params(params):
    """Transpose PyTorch (out, in) weights to (in, out) and cast to bf16 once.
    Biases become (1, out) f32.  No padding of state_dim or n_actions."""
    prepped = {}
    for i in range(1, 5):
        prepped[f"w{i}"] = params[f"w{i}"].T.astype(jnp.bfloat16)      # (in, out)
        prepped[f"b{i}"] = params[f"b{i}"].reshape(1, -1).astype(jnp.float32)
    return prepped


# ---------------------------------------------------------------------------
# Batch tiling selection
# ---------------------------------------------------------------------------
_TM_MAX = 2048   # large tiles: per-grid-step overhead (~0.35us) >> tile compute


def _pick_batch_tiling(batch, tm=None):
    if tm is None:
        n_tiles = max(1, _cdiv(batch, _TM_MAX))
        if n_tiles == 1 and batch > 256:
            n_tiles = 2                      # give v7x's two TCs work to split
        if n_tiles == 1:
            tm = batch                       # full-dim block: no row padding
        else:
            tm = _round_up(_cdiv(batch, n_tiles), 8)   # minimal row padding
    batch_pad = _round_up(batch, tm)
    return tm, batch_pad


# ---------------------------------------------------------------------------
# Forward wrapper
# ---------------------------------------------------------------------------
def dqn_forward(x, prepped, *, tm=None):
    """x: (batch, state_dim) f32 or bf16. prepped: output of prepare_dqn_params."""
    batch, state_dim = x.shape
    assert prepped["w1"].shape[0] == state_dim, "state_dim mismatch with params"
    n_actions = prepped["w4"].shape[1]

    tm, batch_pad = _pick_batch_tiling(batch, tm)
    x_p = x if batch_pad == batch else jnp.pad(x, ((0, batch_pad - batch), (0, 0)))

    grid = (batch_pad // tm,)
    weights = (prepped["w1"], prepped["b1"],
               prepped["w2"], prepped["b2"],
               prepped["w3"], prepped["b3"],
               prepped["w4"], prepped["b4"])

    def _call(single_buffer_weights):
        const2 = lambda i: (0, 0)
        wkw = ({"pipeline_mode": pl.Buffered(1)} if single_buffer_weights else {})
        in_specs = [pl.BlockSpec((tm, state_dim), lambda i: (i, 0))]   # x tile
        in_specs += [pl.BlockSpec(w.shape, const2, **wkw) for w in weights]
        out_spec = pl.BlockSpec((tm, n_actions), lambda i: (i, 0))     # unpadded head

        return pl.pallas_call(
            _dqn_kernel,
            out_shape=jax.ShapeDtypeStruct((batch_pad, n_actions), jnp.float32),
            grid=grid,
            in_specs=in_specs,
            out_specs=out_spec,
            compiler_params=pltpu.CompilerParams(
                dimension_semantics=("parallel",),   # batch tiles across TCs (v7x)
                vmem_limit_bytes=32 * 1024 * 1024,
            ),
        )(x_p, *weights)

    try:
        # Weights never change block index -> a single pipeline buffer suffices.
        out = _call(True)
    except Exception:
        # Fallback for JAX versions that reject pipeline_mode / Buffered(1).
        out = _call(False)

    return out if batch_pad == batch else out[:batch]


# ---------------------------------------------------------------------------
# Synthetic init (PyTorch nn.Linear layout: weight (out, in), bias (out,))
# ---------------------------------------------------------------------------
def init_dqn_params(key, state_dim, n_actions):
    dims = [(128, state_dim), (128, 128), (256, 128), (n_actions, 256)]
    params = {}
    for i, (out_d, in_d) in enumerate(dims, start=1):
        key, kw, kb = jax.random.split(key, 3)
        bound = 1.0 / jnp.sqrt(in_d)
        params[f"w{i}"] = jax.random.uniform(
            kw, (out_d, in_d), jnp.float32, -bound, bound)
        params[f"b{i}"] = jax.random.uniform(
            kb, (out_d,), jnp.float32, -bound, bound)
    return params


# ---------------------------------------------------------------------------
# References
# ---------------------------------------------------------------------------
def dqn_reference_f32(x, params):
    """Pure-f32 reference of the PyTorch forward (semantic check)."""
    h = jnp.maximum(x @ params["w1"].T + params["b1"], 0.0)
    h = jnp.maximum(h @ params["w2"].T + params["b2"], 0.0)
    h = jnp.maximum(h @ params["w3"].T + params["b3"], 0.0)
    return h @ params["w4"].T + params["b4"]


def dqn_reference_bf16(x, params):
    """Reference that mirrors the kernel's numerics (bf16 operands, f32 acc)."""
    def lin(h, w, b):
        return jnp.dot(h.astype(jnp.bfloat16), w.T.astype(jnp.bfloat16),
                       preferred_element_type=jnp.float32) + b
    h = jnp.maximum(lin(x, params["w1"], params["b1"]), 0.0)
    h = jnp.maximum(lin(h, params["w2"], params["b2"]), 0.0)
    h = jnp.maximum(lin(h, params["w3"], params["b3"]), 0.0)
    return lin(h, params["w4"], params["b4"])


if __name__ == "__main__":
    key = jax.random.PRNGKey(0)
    batch, state_dim, n_actions = 2, 32, 8

    key, kx = jax.random.split(key)
    x = jax.random.normal(kx, (batch, state_dim), jnp.float32)
    params = init_dqn_params(key, state_dim, n_actions)

    # One-time prep (transpose / bf16 cast) — not paid per forward call.
    prepped = prepare_dqn_params(params)

    out = dqn_forward(x, prepped)
    out = jax.block_until_ready(out)
    assert out.shape == (batch, n_actions), out.shape

    # Tight check vs a reference with matching (bf16 x bf16 -> f32) numerics.
    ref_bf16 = dqn_reference_bf16(x, params)
    assert jnp.allclose(out, ref_bf16, atol=2e-3, rtol=2e-3), (
        f"max abs err vs bf16 ref {jnp.max(jnp.abs(out - ref_bf16))}")

    # Loose semantic check vs the full-f32 PyTorch-equivalent forward.
    ref_f32 = dqn_reference_f32(x, params)
    assert jnp.allclose(out, ref_f32, atol=1e-1, rtol=1e-1), (
        f"max abs err vs f32 ref {jnp.max(jnp.abs(out - ref_f32))}")

    print("KERNEL_OK")
</pallas_src>

<mosaic_0001>
module attributes {stable_mosaic.version = 11 : i64} {
  func.func @_dqn_kernel(%arg0: i32, %arg1: memref<2x32xf32, #tpu.memory_space<vmem>>, %arg2: memref<32x128xbf16, #tpu.memory_space<vmem>>, %arg3: memref<1x128xf32, #tpu.memory_space<vmem>>, %arg4: memref<128x128xbf16, #tpu.memory_space<vmem>>, %arg5: memref<1x128xf32, #tpu.memory_space<vmem>>, %arg6: memref<128x256xbf16, #tpu.memory_space<vmem>>, %arg7: memref<1x256xf32, #tpu.memory_space<vmem>>, %arg8: memref<256x8xbf16, #tpu.memory_space<vmem>>, %arg9: memref<1x8xf32, #tpu.memory_space<vmem>>, %arg10: memref<2x8xf32, #tpu.memory_space<vmem>>) attributes {dimension_semantics = [#tpu.dimension_semantics<parallel>], iteration_bounds = array<i64: 1>, scalar_prefetch = 0 : i64, scratch_operands = 0 : i64, tpu.core_type = #tpu.core_type<tc>, window_params = [{transform_indices = @transform_0, window_bounds = array<i64: 2, 32>}, {pipeline_mode = #tpu.pipeline_mode<synchronous>, transform_indices = @transform_1, window_bounds = array<i64: 32, 128>}, {pipeline_mode = #tpu.pipeline_mode<synchronous>, transform_indices = @transform_2, window_bounds = array<i64: 1, 128>}, {pipeline_mode = #tpu.pipeline_mode<synchronous>, transform_indices = @transform_3, window_bounds = array<i64: 128, 128>}, {pipeline_mode = #tpu.pipeline_mode<synchronous>, transform_indices = @transform_4, window_bounds = array<i64: 1, 128>}, {pipeline_mode = #tpu.pipeline_mode<synchronous>, transform_indices = @transform_5, window_bounds = array<i64: 128, 256>}, {pipeline_mode = #tpu.pipeline_mode<synchronous>, transform_indices = @transform_6, window_bounds = array<i64: 1, 256>}, {pipeline_mode = #tpu.pipeline_mode<synchronous>, transform_indices = @transform_7, window_bounds = array<i64: 256, 8>}, {pipeline_mode = #tpu.pipeline_mode<synchronous>, transform_indices = @transform_8, window_bounds = array<i64: 1, 8>}, {transform_indices = @transform_9, window_bounds = array<i64: 2, 8>}]} {
    %c0 = arith.constant 0 : index
    %c0_0 = arith.constant 0 : index
    %0 = vector.load %arg1[%c0, %c0_0] : memref<2x32xf32, #tpu.memory_space<vmem>>, vector<2x32xf32>
    %1 = arith.truncf %0 : vector<2x32xf32> to vector<2x32xbf16>
    %c0_1 = arith.constant 0 : index
    %c0_2 = arith.constant 0 : index
    %2 = vector.load %arg2[%c0_1, %c0_2] : memref<32x128xbf16, #tpu.memory_space<vmem>>, vector<32x128xbf16>
    %cst = arith.constant dense<0.000000e+00> : vector<2x128xf32>
    %3 = tpu.matmul %1, %2, %cst {dimension_numbers = #tpu.dot_dimension_numbers<[1], [0], [0], [1], [0, 0, 1, 1], [], []>} : vector<2x32xbf16>, vector<32x128xbf16>, vector<2x128xf32> -> vector<2x128xf32>
    %c0_3 = arith.constant 0 : index
    %c0_4 = arith.constant 0 : index
    %4 = vector.load %arg3[%c0_3, %c0_4] : memref<1x128xf32, #tpu.memory_space<vmem>>, vector<1x128xf32>
    %5 = vector.broadcast %4 : vector<1x128xf32> to vector<2x128xf32>
    %6 = arith.addf %3, %5 : vector<2x128xf32>
    %cst_5 = arith.constant 0.000000e+00 : f32
    %7 = vector.broadcast %cst_5 : f32 to vector<2x128xf32>
    %8 = arith.maximumf %6, %7 : vector<2x128xf32>
    %9 = arith.truncf %8 : vector<2x128xf32> to vector<2x128xbf16>
    %c0_6 = arith.constant 0 : index
    %c0_7 = arith.constant 0 : index
    %10 = vector.load %arg4[%c0_6, %c0_7] : memref<128x128xbf16, #tpu.memory_space<vmem>>, vector<128x128xbf16>
    %cst_8 = arith.constant dense<0.000000e+00> : vector<2x128xf32>
    %11 = tpu.matmul %9, %10, %cst_8 {dimension_numbers = #tpu.dot_dimension_numbers<[1], [0], [0], [1], [0, 0, 1, 1], [], []>} : vector<2x128xbf16>, vector<128x128xbf16>, vector<2x128xf32> -> vector<2x128xf32>
    %c0_9 = arith.constant 0 : index
    %c0_10 = arith.constant 0 : index
    %12 = vector.load %arg5[%c0_9, %c0_10] : memref<1x128xf32, #tpu.memory_space<vmem>>, vector<1x128xf32>
    %13 = vector.broadcast %12 : vector<1x128xf32> to vector<2x128xf32>
    %14 = arith.addf %11, %13 : vector<2x128xf32>
    %cst_11 = arith.constant 0.000000e+00 : f32
    %15 = vector.broadcast %cst_11 : f32 to vector<2x128xf32>
    %16 = arith.maximumf %14, %15 : vector<2x128xf32>
    %17 = arith.truncf %16 : vector<2x128xf32> to vector<2x128xbf16>
    %c0_12 = arith.constant 0 : index
    %c0_13 = arith.constant 0 : index
    %18 = vector.load %arg6[%c0_12, %c0_13] : memref<128x256xbf16, #tpu.memory_space<vmem>>, vector<128x256xbf16>
    %cst_14 = arith.constant dense<0.000000e+00> : vector<2x256xf32>
    %19 = tpu.matmul %17, %18, %cst_14 {dimension_numbers = #tpu.dot_dimension_numbers<[1], [0], [0], [1], [0, 0, 1, 1], [], []>} : vector<2x128xbf16>, vector<128x256xbf16>, vector<2x256xf32> -> vector<2x256xf32>
    %c0_15 = arith.constant 0 : index
    %c0_16 = arith.constant 0 : index
    %20 = vector.load %arg7[%c0_15, %c0_16] : memref<1x256xf32, #tpu.memory_space<vmem>>, vector<1x256xf32>
    %21 = vector.broadcast %20 : vector<1x256xf32> to vector<2x256xf32>
    %22 = arith.addf %19, %21 : vector<2x256xf32>
    %cst_17 = arith.constant 0.000000e+00 : f32
    %23 = vector.broadcast %cst_17 : f32 to vector<2x256xf32>
    %24 = arith.maximumf %22, %23 : vector<2x256xf32>
    %25 = arith.truncf %24 : vector<2x256xf32> to vector<2x256xbf16>
    %c0_18 = arith.constant 0 : index
    %c0_19 = arith.constant 0 : index
    %26 = vector.load %arg8[%c0_18, %c0_19] : memref<256x8xbf16, #tpu.memory_space<vmem>>, vector<256x8xbf16>
    %cst_20 = arith.constant dense<0.000000e+00> : vector<2x8xf32>
    %27 = tpu.matmul %25, %26, %cst_20 {dimension_numbers = #tpu.dot_dimension_numbers<[1], [0], [0], [1], [0, 0, 1, 1], [], []>} : vector<2x256xbf16>, vector<256x8xbf16>, vector<2x8xf32> -> vector<2x8xf32>
    %c0_21 = arith.constant 0 : index
    %c0_22 = arith.constant 0 : index
    %28 = vector.load %arg9[%c0_21, %c0_22] : memref<1x8xf32, #tpu.memory_space<vmem>>, vector<1x8xf32>
    %29 = vector.broadcast %28 : vector<1x8xf32> to vector<2x8xf32>
    %30 = arith.addf %27, %29 : vector<2x8xf32>
    %c0_23 = arith.constant 0 : index
    %c0_24 = arith.constant 0 : index
    %31 = vector.load %arg10[%c0_23, %c0_24] : memref<2x8xf32, #tpu.memory_space<vmem>>, vector<2x8xf32>
    tpu.vector_store %arg10[%c0_23, %c0_24], %30 {strides = array<i32>} : memref<2x8xf32, #tpu.memory_space<vmem>>, vector<2x8xf32>,
    return
  }
  func.func @transform_0(%arg0: i32) -> (i32, i32) {
    %c0_i32 = arith.constant 0 : i32
    %c0_i32_0 = arith.constant 0 : i32
    return %arg0, %c0_i32 : i32, i32
  }
  func.func @transform_1(%arg0: i32) -> (i32, i32) {
    %c0_i32 = arith.constant 0 : i32
    %c0_i32_0 = arith.constant 0 : i32
    %c0_i32_1 = arith.constant 0 : i32
    return %c0_i32, %c0_i32_0 : i32, i32
  }
  func.func @transform_2(%arg0: i32) -> (i32, i32) {
    %c0_i32 = arith.constant 0 : i32
    %c0_i32_0 = arith.constant 0 : i32
    %c0_i32_1 = arith.constant 0 : i32
    return %c0_i32, %c0_i32_0 : i32, i32
  }
  func.func @transform_3(%arg0: i32) -> (i32, i32) {
    %c0_i32 = arith.constant 0 : i32
    %c0_i32_0 = arith.constant 0 : i32
    %c0_i32_1 = arith.constant 0 : i32
    return %c0_i32, %c0_i32_0 : i32, i32
  }
  func.func @transform_4(%arg0: i32) -> (i32, i32) {
    %c0_i32 = arith.constant 0 : i32
    %c0_i32_0 = arith.constant 0 : i32
    %c0_i32_1 = arith.constant 0 : i32
    return %c0_i32, %c0_i32_0 : i32, i32
  }
  func.func @transform_5(%arg0: i32) -> (i32, i32) {
    %c0_i32 = arith.constant 0 : i32
    %c0_i32_0 = arith.constant 0 : i32
    %c0_i32_1 = arith.constant 0 : i32
    return %c0_i32, %c0_i32_0 : i32, i32
  }
  func.func @transform_6(%arg0: i32) -> (i32, i32) {
    %c0_i32 = arith.constant 0 : i32
    %c0_i32_0 = arith.constant 0 : i32
    %c0_i32_1 = arith.constant 0 : i32
    return %c0_i32, %c0_i32_0 : i32, i32
  }
  func.func @transform_7(%arg0: i32) -> (i32, i32) {
    %c0_i32 = arith.constant 0 : i32
    %c0_i32_0 = arith.constant 0 : i32
    %c0_i32_1 = arith.constant 0 : i32
    return %c0_i32, %c0_i32_0 : i32, i32
  }
  func.func @transform_8(%arg0: i32) -> (i32, i32) {
    %c0_i32 = arith.constant 0 : i32
    %c0_i32_0 = arith.constant 0 : i32
    %c0_i32_1 = arith.constant 0 : i32
    return %c0_i32, %c0_i32_0 : i32, i32
  }
  func.func @transform_9(%arg0: i32) -> (i32, i32) {
    %c0_i32 = arith.constant 0 : i32
    %c0_i32_0 = arith.constant 0 : i32
    return %arg0, %c0_i32 : i32, i32
  }
}

module attributes {stable_mosaic.version = 11 : i64} {
  func.func @_dqn_kernel(%arg0: i32, %arg1: memref<2x32xf32, #tpu.memory_space<vmem>>, %arg2: memref<32x128xbf16, #tpu.memory_space<vmem>>, %arg3: memref<1x128xf32, #tpu.memory_space<vmem>>, %arg4: memref<128x128xbf16, #tpu.memory_space<vmem>>, %arg5: memref<1x128xf32, #tpu.memory_space<vmem>>, %arg6: memref<128x256xbf16, #tpu.memory_space<vmem>>, %arg7: memref<1x256xf32, #tpu.memory_space<vmem>>, %arg8: memref<256x8xbf16, #tpu.memory_space<vmem>>, %arg9: memref<1x8xf32, #tpu.memory_space<vmem>>, %arg10: memref<2x8xf32, #tpu.memory_space<vmem>>) attributes {dimension_semantics = [#tpu.dimension_semantics<parallel>], iteration_bounds = array<i64: 1>, scalar_prefetch = 0 : i64, scratch_operands = 0 : i64, tpu.core_type = #tpu.core_type<tc>, window_params = [{transform_indices = @transform_0, window_bounds = array<i64: 2, 32>}, {pipeline_mode = #tpu.pipeline_mode<synchronous>, transform_indices = @transform_1, window_bounds = array<i64: 32, 128>}, {pipeline_mode = #tpu.pipeline_mode<synchronous>, transform_indices = @transform_2, window_bounds = array<i64: 1, 128>}, {pipeline_mode = #tpu.pipeline_mode<synchronous>, transform_indices = @transform_3, window_bounds = array<i64: 128, 128>}, {pipeline_mode = #tpu.pipeline_mode<synchronous>, transform_indices = @transform_4, window_bounds = array<i64: 1, 128>}, {pipeline_mode = #tpu.pipeline_mode<synchronous>, transform_indices = @transform_5, window_bounds = array<i64: 128, 256>}, {pipeline_mode = #tpu.pipeline_mode<synchronous>, transform_indices = @transform_6, window_bounds = array<i64: 1, 256>}, {pipeline_mode = #tpu.pipeline_mode<synchronous>, transform_indices = @transform_7, window_bounds = array<i64: 256, 8>}, {pipeline_mode = #tpu.pipeline_mode<synchronous>, transform_indices = @transform_8, window_bounds = array<i64: 1, 8>}, {transform_indices = @transform_9, window_bounds = array<i64: 2, 8>}]} {
    %c0 = arith.constant 0 : index
    %c0_0 = arith.constant 0 : index
    %0 = vector.load %arg1[%c0, %c0_0] : memref<2x32xf32, #tpu.memory_space<vmem>>, vector<2x32xf32>
    %1 = arith.truncf %0 : vector<2x32xf32> to vector<2x32xbf16>
    %c0_1 = arith.constant 0 : index
    %c0_2 = arith.constant 0 : index
    %2 = vector.load %arg2[%c0_1, %c0_2] : memref<32x128xbf16, #tpu.memory_space<vmem>>, vector<32x128xbf16>
    %cst = arith.constant dense<0.000000e+00> : vector<2x128xf32>
    %3 = tpu.matmul %1, %2, %cst {dimension_numbers = #tpu.dot_dimension_numbers<[1], [0], [0], [1], [0, 0, 1, 1], [], []>} : vector<2x32xbf16>, vector<32x128xbf16>, vector<2x128xf32> -> vector<2x128xf32>
    %c0_3 = arith.constant 0 : index
    %c0_4 = arith.constant 0 : index
    %4 = vector.load %arg3[%c0_3, %c0_4] : memref<1x128xf32, #tpu.memory_space<vmem>>, vector<1x128xf32>
    %5 = vector.broadcast %4 : vector<1x128xf32> to vector<2x128xf32>
    %6 = arith.addf %3, %5 : vector<2x128xf32>
    %cst_5 = arith.constant 0.000000e+00 : f32
    %7 = vector.broadcast %cst_5 : f32 to vector<2x128xf32>
    %8 = arith.maximumf %6, %7 : vector<2x128xf32>
    %9 = arith.truncf %8 : vector<2x128xf32> to vector<2x128xbf16>
    %c0_6 = arith.constant 0 : index
    %c0_7 = arith.constant 0 : index
    %10 = vector.load %arg4[%c0_6, %c0_7] : memref<128x128xbf16, #tpu.memory_space<vmem>>, vector<128x128xbf16>
    %cst_8 = arith.constant dense<0.000000e+00> : vector<2x128xf32>
    %11 = tpu.matmul %9, %10, %cst_8 {dimension_numbers = #tpu.dot_dimension_numbers<[1], [0], [0], [1], [0, 0, 1, 1], [], []>} : vector<2x128xbf16>, vector<128x128xbf16>, vector<2x128xf32> -> vector<2x128xf32>
    %c0_9 = arith.constant 0 : index
    %c0_10 = arith.constant 0 : index
    %12 = vector.load %arg5[%c0_9, %c0_10] : memref<1x128xf32, #tpu.memory_space<vmem>>, vector<1x128xf32>
    %13 = vector.broadcast %12 : vector<1x128xf32> to vector<2x128xf32>
    %14 = arith.addf %11, %13 : vector<2x128xf32>
    %cst_11 = arith.constant 0.000000e+00 : f32
    %15 = vector.broadcast %cst_11 : f32 to vector<2x128xf32>
    %16 = arith.maximumf %14, %15 : vector<2x128xf32>
    %17 = arith.truncf %16 : vector<2x128xf32> to vector<2x128xbf16>
    %c0_12 = arith.constant 0 : index
    %c0_13 = arith.constant 0 : index
    %18 = vector.load %arg6[%c0_12, %c0_13] : memref<128x256xbf16, #tpu.memory_space<vmem>>, vector<128x256xbf16>
    %cst_14 = arith.constant dense<0.000000e+00> : vector<2x256xf32>
    %19 = tpu.matmul %17, %18, %cst_14 {dimension_numbers = #tpu.dot_dimension_numbers<[1], [0], [0], [1], [0, 0, 1, 1], [], []>} : vector<2x128xbf16>, vector<128x256xbf16>, vector<2x256xf32> -> vector<2x256xf32>
    %c0_15 = arith.constant 0 : index
    %c0_16 = arith.constant 0 : index
    %20 = vector.load %arg7[%c0_15, %c0_16] : memref<1x256xf32, #tpu.memory_space<vmem>>, vector<1x256xf32>
    %21 = vector.broadcast %20 : vector<1x256xf32> to vector<2x256xf32>
    %22 = arith.addf %19, %21 : vector<2x256xf32>
    %cst_17 = arith.constant 0.000000e+00 : f32
    %23 = vector.broadcast %cst_17 : f32 to vector<2x256xf32>
    %24 = arith.maximumf %22, %23 : vector<2x256xf32>
    %25 = arith.truncf %24 : vector<2x256xf32> to vector<2x256xbf16>
    %c0_18 = arith.constant 0 : index
    %c0_19 = arith.constant 0 : index
    %26 = vector.load %arg8[%c0_18, %c0_19] : memref<256x8xbf16, #tpu.memory_space<vmem>>, vector<256x8xbf16>
    %cst_20 = arith.constant dense<0.000000e+00> : vector<2x8xf32>
    %27 = tpu.matmul %25, %26, %cst_20 {dimension_numbers = #tpu.dot_dimension_numbers<[1], [0], [0], [1], [0, 0, 1, 1], [], []>} : vector<2x256xbf16>, vector<256x8xbf16>, vector<2x8xf32> -> vector<2x8xf32>
    %c0_21 = arith.constant 0 : index
    %c0_22 = arith.constant 0 : index
    %28 = vector.load %arg9[%c0_21, %c0_22] : memref<1x8xf32, #tpu.memory_space<vmem>>, vector<1x8xf32>
    %29 = vector.broadcast %28 : vector<1x8xf32> to vector<2x8xf32>
    %30 = arith.addf %27, %29 : vector<2x8xf32>
    %c0_23 = arith.constant 0 : index
    %c0_24 = arith.constant 0 : index
    %31 = vector.load %arg10[%c0_23, %c0_24] : memref<2x8xf32, #tpu.memory_space<vmem>>, vector<2x8xf32>
    tpu.vector_store %arg10[%c0_23, %c0_24], %30 {strides = array<i32>} : memref<2x8xf32, #tpu.memory_space<vmem>>, vector<2x8xf32>,
    return
  }
  func.func @transform_0(%arg0: i32) -> (i32, i32) {
    %c0_i32 = arith.constant 0 : i32
    %c0_i32_0 = arith.constant 0 : i32
    return %arg0, %c0_i32 : i32, i32
  }
  func.func @transform_1(%arg0: i32) -> (i32, i32) {
    %c0_i32 = arith.constant 0 : i32
    %c0_i32_0 = arith.constant 0 : i32
    %c0_i32_1 = arith.constant 0 : i32
    return %c0_i32, %c0_i32_0 : i32, i32
  }
  func.func @transform_2(%arg0: i32) -> (i32, i32) {
    %c0_i32 = arith.constant 0 : i32
    %c0_i32_0 = arith.constant 0 : i32
    %c0_i32_1 = arith.constant 0 : i32
    return %c0_i32, %c0_i32_0 : i32, i32
  }
  func.func @transform_3(%arg0: i32) -> (i32, i32) {
    %c0_i32 = arith.constant 0 : i32
    %c0_i32_0 = arith.constant 0 : i32
    %c0_i32_1 = arith.constant 0 : i32
    return %c0_i32, %c0_i32_0 : i32, i32
  }
  func.func @transform_4(%arg0: i32) -> (i32, i32) {
    %c0_i32 = arith.constant 0 : i32
    %c0_i32_0 = arith.constant 0 : i32
    %c0_i32_1 = arith.constant 0 : i32
    return %c0_i32, %c0_i32_0 : i32, i32
  }
  func.func @transform_5(%arg0: i32) -> (i32, i32) {
    %c0_i32 = arith.constant 0 : i32
    %c0_i32_0 = arith.constant 0 : i32
    %c0_i32_1 = arith.constant 0 : i32
    return %c0_i32, %c0_i32_0 : i32, i32
  }
  func.func @transform_6(%arg0: i32) -> (i32, i32) {
    %c0_i32 = arith.constant 0 : i32
    %c0_i32_0 = arith.constant 0 : i32
    %c0_i32_1 = arith.constant 0 : i32
    return %c0_i32, %c0_i32_0 : i32, i32
  }
  func.func @transform_7(%arg0: i32) -> (i32, i32) {
    %c0_i32 = arith.constant 0 : i32
    %c0_i32_0 = arith.constant 0 : i32
    %c0_i32_1 = arith.constant 0 : i32
    return %c0_i32, %c0_i32_0 : i32, i32
  }
  func.func @transform_8(%arg0: i32) -> (i32, i32) {
    %c0_i32 = arith.constant 0 : i32
    %c0_i32_0 = arith.constant 0 : i32
    %c0_i32_1 = arith.constant 0 : i32
    return %c0_i32, %c0_i32_0 : i32, i32
  }
  func.func @transform_9(%arg0: i32) -> (i32, i32) {
    %c0_i32 = arith.constant 0 : i32
    %c0_i32_0 = arith.constant 0 : i32
    return %arg0, %c0_i32 : i32, i32
  }
}

</mosaic_0001>

<bundles_post_ra>
// kernel: tpu_custom_call.1
= control target key start
LH: loop header
LB: loop body
LE: loop exit
PB: predicated region body
PF: predicated region fallthrough
CT: control target
= control target key end

     0   :  { %14 = vsyncpa [#allocation3], 0  ;;  %s988_s0 = inlined_call_operand.vmem [shape: f32[2,32], index: 0, kind: input, shape index: {}]   ;;  %s989_s1 = inlined_call_operand.vmem [shape: bf16[32,128], index: 1, kind: input, shape index: {}]   ;;  %s990_s2 = inlined_call_operand.vmem [shape: f32[1,128], index: 2, kind: input, shape index: {}]   ;;  %s991_s3 = inlined_call_operand.hbm [shape: bf16[128,128], index: 3, kind: input, shape index: {}]   ;;  %s992_s4 = inlined_call_operand.vmem [shape: f32[1,128], index: 4, kind: input, shape index: {}]   ;;  %s993_s5 = inlined_call_operand.vmem [shape: bf16[128,256], index: 5, kind: input, shape index: {}]   ;;  %s994_s6 = inlined_call_operand.vmem [shape: f32[1,256], index: 6, kind: input, shape index: {}]   ;;  %s995_s7 = inlined_call_operand.vmem [shape: bf16[256,8], index: 7, kind: input, shape index: {}]   ;;  %s996_s8 = inlined_call_operand.vmem [shape: f32[1,8], index: 8, kind: input, shape index: {}]   ;;  %s997_s9 = inlined_call_operand.hbm [shape: f32[2,8], index: 9, kind: output, shape index: {}]  }
   0x1   :  { %15 = vsyncpa [#allocation4], 0  ;;  %s790_s30 = smov [#allocation2]   ;;  %s742_s13 = scalar_lea.hbm %s991_s3, 1024 }
   0x2   :  { %s27_s10 = sshll.u32 %s790_s30, 4  ;;  %p743_p0 = scmp.ne.s32.totalorder %s991_s3, %s742_s13  ;;  %s28_s10 = int_to_ptr.vmem [resolvable:$true] %s27_s10 }
   0x3   :  { %p746_p1 = scmp.lt.u32.totalorder %s742_s13, %s991_s3 }
   0x5   :  { %p748_p2 = pnand %p746_p1, %p743_p0 }
   0x7   :  { %751 = shalt.err (!%p748_p2)
}
   0x8   :  { %s752_s18 = scalar_lea.vmem %s28_s10, 1024  ;;  %p757_p4 = scmp.lt.s32.totalorder %s28_s10, %s28_s10 }
   0x9   :  { %p753_p3 = scmp.ne.s32.totalorder %s28_s10, %s752_s18  ;;  %p758_p5 = scmp.lt.s32.totalorder %s752_s18, %s752_s18 }
   0xb   :  { %p759_p6 = por %p758_p5, %p757_p4 }
   0xd   :  { %p760_p7 = pnand %p759_p6, %p753_p3 }
   0xf   :  { %763 = shalt.err (!%p760_p7)
}
  0x10   :  { %s791_s19 = smov 64   ;;  %s792_s20 = smov 4  }
  0x11   :  { %33 = dma.hbm_to_vmem [thread:$0]  %s991_s3, 1024, %s28_s10, [#allocation3], %s791_s19, %s791_s19, %s792_s20  }
  0x12   :  { %786 = dma.done.wait [#allocation3], 1024  }
  0x13   :  { %787 = vsyncadd [#allocation3], 4294966272  ;;  %v793_v0 = vmov 0.0   ;;  %vm794_vm0 = vmmov 0   ;;  %v692_v1 = vld [vmem:[%s989_s1] sm:$0xff]   ;;  %v693_v2 = vld [vmem:[%s989_s1 + $0x8] sm:$0xff]   ;;  %v250_v62 = vlaneseq }
  0x14   :  { %657 = vmatprep.subr.bf16.mxu0 %v793_v0  ;;  %661 = vmatprep.mubr.msk.bf16.mxu0 %vm794_vm0, %v793_v0  ;;  %v48_v3 = vld [vmem:[%s988_s0] sm:$0x3]  ;;  %v695_v6 = vld [vmem:[#allocation2 + $0x8] sm:$0xff]   ;;  %vm73_vm1 = vcmask 261120   ;;  %v696_v7 = vld [vmem:[#allocation2 + $0x10] sm:$0xff]   ;;  %v795_v37 = vmov 0  }
  0x15   :  { %665 = vmatprep.subr.bf16.mxu1 %v793_v0  ;;  %681 = vmatprep.mubr.msk.bf16.mxu1 %vm794_vm0, %v793_v0  ;;  %v694_v4 = vld [vmem:[#allocation2] sm:$0xff]   ;;  %v49_v5 = vpack.c.bf16 %v48_v3, %v48_v3  ;;  %v697_v8 = vld [vmem:[#allocation2 + $0x18] sm:$0xff]   ;;  %v699_v10 = vld [vmem:[#allocation2 + $0x28] sm:$0xff]   ;;  %v251_v63 = vshrl.u32 %v250_v62, 7  ;;  %vm560_vm2 = vcmask 58368  }
  0x16   :  { %658 = vmatpush3.bf16.msra.mxu0 %v692_v1  ;;  %666 = vmatpush3.bf16.msra.mxu1 %v694_v4  ;;  %v698_v9 = vld [vmem:[#allocation2 + $0x20] sm:$0xff]   ;;  %v700_v11 = vld [vmem:[#allocation2 + $0x30] sm:$0xff]   ;;  %v701_v12 = vld [vmem:[#allocation2 + $0x38] sm:$0xff]  }
  0x17   :  { %659 = vmatprep.subr.bf16.mxu0 %v793_v0  ;;  %667 = vmatprep.subr.bf16.mxu1 %v793_v0  ;;  %v702_v13 = vld [vmem:[%s993_s5] ss:$8 sps:$4 sm:$0xff]   ;;  %v704_v14 = vld [vmem:[%s993_s5 + $0x4] ss:$8 sps:$4 sm:$0xff]   ;;  %v707_v15 = vld [vmem:[%s993_s5 + $0x14] ss:$8 sps:$4 sm:$0xff]  }
  0x18   :  { %v705_v16 = vld [vmem:[%s993_s5 + $0x10] ss:$8 sps:$4 sm:$0xff]   ;;  %v710_v17 = vld [vmem:[%s993_s5 + $0x24] ss:$8 sps:$4 sm:$0xff]   ;;  %v708_v18 = vld [vmem:[%s993_s5 + $0x20] ss:$8 sps:$4 sm:$0xff]  }
  0x19   :  { %v713_v19 = vld [vmem:[%s993_s5 + $0x34] ss:$8 sps:$4 sm:$0xff]   ;;  %v711_v20 = vld [vmem:[%s993_s5 + $0x30] ss:$8 sps:$4 sm:$0xff]   ;;  %v716_v21 = vld [vmem:[%s993_s5 + $0x44] ss:$8 sps:$4 sm:$0xff]  }
  0x1a   :  { %660 = vmatpush3.bf16.msra.mxu0 %v693_v2  ;;  %668 = vmatpush3.bf16.msra.mxu1 %v695_v6  ;;  %v714_v22 = vld [vmem:[%s993_s5 + $0x40] ss:$8 sps:$4 sm:$0xff]   ;;  %v719_v23 = vld [vmem:[%s993_s5 + $0x54] ss:$8 sps:$4 sm:$0xff]   ;;  %v717_v24 = vld [vmem:[%s993_s5 + $0x50] ss:$8 sps:$4 sm:$0xff]  }
  0x1b   :  { %669 = vmatprep.subr.bf16.mxu1 %v793_v0  ;;  %340 = vmatprep.subr.bf16.mxu0 %v704_v14  ;;  %v722_v25 = vld [vmem:[%s993_s5 + $0x64] ss:$8 sps:$4 sm:$0xff]   ;;  %v720_v26 = vld [vmem:[%s993_s5 + $0x60] ss:$8 sps:$4 sm:$0xff]   ;;  %v725_v35 = vld [vmem:[%s993_s5 + $0x74] ss:$8 sps:$4 sm:$0xff]  }
  0x1c   :  { %v577_v27 = vld [vmem:[%s990_s2] ss:$0 sm:$0xff]  ;;  %v723_v36 = vld [vmem:[%s993_s5 + $0x70] ss:$8 sps:$4 sm:$0xff]   ;;  %v728_v40 = vld [vmem:[%s995_s7 + $0x48] sm:$0xff]   ;;  %v256_v2 = vsub.s32 1, %v251_v63 }
  0x1d   :  { %662 = vmatmul.mubr.msk.bf16.vlgmr.msra.gmra.mrb[0].mxu0 %vm73_vm1, %v49_v5  ;;  %v726_v38 = vld [vmem:[%s995_s7 + $0x40] sm:$0xff]   ;;  %v729_v41 = vld [vmem:[%s995_s7 + $0x8] sm:$0xff]   ;;  %v730_v42 = vld [vmem:[%s995_s7 + $0x50] sm:$0xff]  }
  0x1e   :  { %670 = vmatpush3.bf16.msra.mxu1 %v696_v7  ;;  %341 = vmatpush1.bf16.msra.mxu0 %v702_v13  ;;  %v727_v39 = vld [vmem:[%s995_s7] sm:$0xff]   ;;  %v731_v43 = vld [vmem:[%s995_s7 + $0x10] sm:$0xff]   ;;  %v732_v44 = vld [vmem:[%s995_s7 + $0x58] sm:$0xff]  }
  0x1f   :  { %671 = vmatprep.subr.bf16.mxu1 %v793_v0  ;;  %342 = vmatprep.subr.bf16.mxu0 %v707_v15  ;;  %v733_v45 = vld [vmem:[%s995_s7 + $0x18] sm:$0xff]   ;;  %v734_v46 = vld [vmem:[%s995_s7 + $0x60] sm:$0xff]   ;;  %v736_v48 = vld [vmem:[%s995_s7 + $0x68] sm:$0xff]  }
  0x20   :  { %372 = vmatprep.mubr.bf16.mxu0 %v795_v37  ;;  %v735_v47 = vld [vmem:[%s995_s7 + $0x20] sm:$0xff]   ;;  %v737_v49 = vld [vmem:[%s995_s7 + $0x28] sm:$0xff]   ;;  %v738_v58 = vld [vmem:[%s995_s7 + $0x70] sm:$0xff]  }
  0x21   :  { %v581_v50 = vld [vmem:[%s992_s4] ss:$0 sm:$0xff]  ;;  %v739_v59 = vld [vmem:[%s995_s7 + $0x30] sm:$0xff]   ;;  %v740_v60 = vld [vmem:[%s995_s7 + $0x78] sm:$0xff]  }
  0x22   :  { %672 = vmatpush3.bf16.msra.mxu1 %v697_v8  ;;  %343 = vmatpush1.bf16.msra.mxu0 %v705_v16  ;;  %v741_v61 = vld [vmem:[%s995_s7 + $0x38] sm:$0xff]   ;;  %v248_v1 = vld [vmem:[%s994_s6] sm:$0x3]  ;;  %s796_s6 = smov [#allocation5]  }
  0x23   :  { %673 = vmatprep.subr.bf16.mxu1 %v793_v0  ;;  %344 = vmatprep.subr.bf16.mxu0 %v710_v17  ;;  %v257_v4 = vrot.slane %v248_v1, %v256_v2  ;;  %v606_v16 = vld [vmem:[%s996_s8] ss:$0 sm:$0xff]  ;;  %s568_s23 = sshll.u32 %s796_s6, 4  ;;  %s569_s23 = int_to_ptr.vmem [resolvable:$true] %s568_s23 }
  0x24   :  { %s764_s24 = scalar_lea.vmem %s569_s23, 32  ;;  %p769_p9 = scmp.lt.s32.totalorder %s569_s23, %s569_s23 }
  0x25   :  { %p765_p8 = scmp.ne.s32.totalorder %s569_s23, %s764_s24  ;;  %p770_p10 = scmp.lt.s32.totalorder %s764_s24, %s764_s24 }
  0x26   :  { %674 = vmatpush3.bf16.msra.mxu1 %v698_v9  ;;  %345 = vmatpush1.bf16.msra.mxu0 %v708_v18 }
  0x27   :  { %675 = vmatprep.subr.bf16.mxu1 %v793_v0  ;;  %346 = vmatprep.subr.bf16.mxu0 %v713_v19  ;;  %p771_p11 = por %p770_p10, %p769_p9 }
  0x29   :  { %p772_p12 = pnand %p771_p11, %p765_p8 }
  0x2a   :  { %676 = vmatpush3.bf16.msra.mxu1 %v699_v10  ;;  %347 = vmatpush1.bf16.msra.mxu0 %v711_v20 }
  0x2b   :  { %677 = vmatprep.subr.bf16.mxu1 %v793_v0  ;;  %348 = vmatprep.subr.bf16.mxu0 %v716_v21 }
  0x2e   :  { %678 = vmatpush3.bf16.msra.mxu1 %v700_v11  ;;  %349 = vmatpush1.bf16.msra.mxu0 %v714_v22 }
  0x2f   :  { %679 = vmatprep.subr.bf16.mxu1 %v793_v0  ;;  %350 = vmatprep.subr.bf16.mxu0 %v719_v23  ;;  %v252_v0 = vsub.s32 0, %v251_v63 }
  0x31   :  { %v253_v3 = vrot.slane %v248_v1, %v252_v0 }
  0x32   :  { %680 = vmatpush3.bf16.msra.mxu1 %v701_v12  ;;  %351 = vmatpush1.bf16.msra.mxu0 %v717_v24 }
  0x33   :  { %352 = vmatprep.subr.bf16.mxu0 %v722_v25  ;;  %635 = vmatprep.subr.bf16.mxu1 %v726_v38 }
  0x36   :  { %353 = vmatpush1.bf16.msra.mxu0 %v720_v26 }
  0x37   :  { %354 = vmatprep.subr.bf16.mxu0 %v725_v35 }
  0x3a   :  { %355 = vmatpush1.bf16.msra.mxu0 %v723_v36 }
  0xf0   :  { %v111_v28 = vpop.f32.mrb[0].mxu0 }
  0xf1   :  { %v112_v29 = vadd.f32 %v577_v27, %v111_v28  ;;  %v663_v30 = vpop.f32.mrb[1].mxu0 }
  0xf2   :  { %v114_v31 = vpop.f32.mrb[2].mxu0 }
  0xf3   :  { %v117_v32 = vmax.f32 %v112_v29, 0.0  ;;  %v664_v33 = vpop.f32.mrb[3].mxu0 }
  0xf5   :  { %v118_v34 = vpack.c.bf16 %v117_v32, %v117_v32 }
  0xf7   :  { %682 = vmatmul.mubr.bf16.vlgmr.msra.gmra.mrb[0].mxu1 %v118_v34 }
  0xf8   :  { %636 = vmatpush3.bf16.msra.mxu1 %v727_v39 }
  0xf9   :  { %637 = vmatprep.subr.bf16.mxu1 %v728_v40 }
  0xfc   :  { %638 = vmatpush3.bf16.msra.mxu1 %v729_v41 }
  0xfd   :  { %639 = vmatprep.subr.bf16.mxu1 %v730_v42 }
 0x100   :  { %640 = vmatpush3.bf16.msra.mxu1 %v731_v43 }
 0x101   :  { %641 = vmatprep.subr.bf16.mxu1 %v732_v44 }
 0x104   :  { %642 = vmatpush3.bf16.msra.mxu1 %v733_v45 }
 0x105   :  { %643 = vmatprep.subr.bf16.mxu1 %v734_v46 }
 0x108   :  { %644 = vmatpush3.bf16.msra.mxu1 %v735_v47 }
 0x109   :  { %645 = vmatprep.subr.bf16.mxu1 %v736_v48 }
 0x10c   :  { %646 = vmatpush3.bf16.msra.mxu1 %v737_v49 }
 0x10d   :  { %647 = vmatprep.subr.bf16.mxu1 %v738_v58 }
 0x110   :  { %648 = vmatpush3.bf16.msra.mxu1 %v739_v59 }
 0x111   :  { %649 = vmatprep.subr.bf16.mxu1 %v740_v60 }
 0x114   :  { %650 = vmatpush3.bf16.msra.mxu1 %v741_v61 }
 0x1ca   :  { %v224_v51 = vpop.f32.mrb[0].mxu1 }
 0x1cb   :  { %v225_v52 = vadd.f32 %v581_v50, %v224_v51  ;;  %v683_v53 = vpop.f32.mrb[1].mxu1 }
 0x1cc   :  { %v227_v54 = vpop.f32.mrb[2].mxu1 }
 0x1cd   :  { %v230_v55 = vmax.f32 %v225_v52, 0.0  ;;  %v684_v56 = vpop.f32.mrb[3].mxu1 }
 0x1cf   :  { %v231_v57 = vpack.c.bf16 %v230_v55, %v230_v55 }
 0x1d1   :  { %373 = vmatmul.mubr.bf16.vlgmr.msra.gmra.mrb[4].mxu0 %v231_v57 }
 0x2a4   :  { %v374_v5 = vpop.f32.mrb[4].mxu0 }
 0x2a5   :  { %v375_v6 = vadd.f32 %v374_v5, %v253_v3  ;;  %v376_v7 = vpop.f32.mrb[5].mxu0 }
 0x2a6   :  { %v377_v8 = vadd.f32 %v376_v7, %v257_v4  ;;  %v378_v9 = vpop.f32.mrb[6].mxu0 }
 0x2a7   :  { %v381_v10 = vmax.f32 %v375_v6, 0.0  ;;  %v379_v11 = vpop.f32.mrb[7].mxu0 }
 0x2a8   :  { %v382_v12 = vmax.f32 %v377_v8, 0.0 }
 0x2a9   :  { %v383_v14 = vpack.c.bf16 %v381_v10, %v381_v10 }
 0x2aa   :  { %v384_v13 = vpack.c.bf16 %v382_v12, %v382_v12 }
 0x2ac   :  { %552 = vmatprep.mubr.bf16.mxu1 %v384_v13 }
 0x2ad   :  { %553 = vmatmul.mubr.bf16.vlgmr.msra.gmra.mrb[4].mxu1 %v383_v14 }
 0x380   :  { %v651_v15 = vpop.f32.mrb[4].mxu1 }
 0x381   :  { %v652_v17 = vpop.f32.mrb[5].mxu1 }
 0x382   :  { %v653_v18 = vadd.f32 %v652_v17, %v651_v15  ;;  %v654_v19 = vpop.f32.mrb[6].mxu1 }
 0x383   :  { %v655_v20 = vpop.f32.mrb[7].mxu1 }
 0x384   :  { %v555_v21 = vadd.f32 %v653_v18, %v606_v16 }
 0x386   :  { %561 = vst.msk [vmem:[#allocation5] sm:$0x3] %vm560_vm2, %v555_v21 }
 0x387   :  { %775 = shalt.err (!%p772_p12)
}
 0x388   :  { %s776_s8 = scalar_lea.hbm %s997_s9, 32 }
 0x389   :  { %p777_p13 = scmp.ne.s32.totalorder %s997_s9, %s776_s8  ;;  %p780_p0 = scmp.lt.u32.totalorder %s776_s8, %s997_s9 }
 0x38b   :  { %p782_p1 = pnand %p780_p0, %p777_p13 }
 0x38d   :  { %785 = shalt.err (!%p782_p1)
}
 0x38e   :  { %571 = dma.vmem_to_hbm [thread:$0]  %s569_s23, 32, %s997_s9, [#allocation4]  }
 0x38f   :  { %788 = dma.done.wait [#allocation4], 32  }
 0x390   :  { %789 = vsyncadd [#allocation4], 4294967264 }
 0x391   :  { %575 = vsyncpa [#allocation3], 1 }
 0x392   :  { %576 = vsyncpa [#allocation4], 1 }

// kernel: tpu_custom_call.1
= control target key start
LH: loop header
LB: loop body
LE: loop exit
PB: predicated region body
PF: predicated region fallthrough
CT: control target
= control target key end

     0   :  { %14 = vsyncpa [#allocation3], 0  ;;  %s988_s0 = inlined_call_operand.vmem [shape: f32[2,32], index: 0, kind: input, shape index: {}]   ;;  %s989_s1 = inlined_call_operand.vmem [shape: bf16[32,128], index: 1, kind: input, shape index: {}]   ;;  %s990_s2 = inlined_call_operand.vmem [shape: f32[1,128], index: 2, kind: input, shape index: {}]   ;;  %s991_s3 = inlined_call_operand.hbm [shape: bf16[128,128], index: 3, kind: input, shape index: {}]   ;;  %s992_s4 = inlined_call_operand.vmem [shape: f32[1,128], index: 4, kind: input, shape index: {}]   ;;  %s993_s5 = inlined_call_operand.vmem [shape: bf16[128,256], index: 5, kind: input, shape index: {}]   ;;  %s994_s6 = inlined_call_operand.vmem [shape: f32[1,256], index: 6, kind: input, shape index: {}]   ;;  %s995_s7 = inlined_call_operand.vmem [shape: bf16[256,8], index: 7, kind: input, shape index: {}]   ;;  %s996_s8 = inlined_call_operand.vmem [shape: f32[1,8], index: 8, kind: input, shape index: {}]   ;;  %s997_s9 = inlined_call_operand.hbm [shape: f32[2,8], index: 9, kind: output, shape index: {}]  }
   0x1   :  { %15 = vsyncpa [#allocation4], 0  ;;  %s790_s30 = smov [#allocation2]   ;;  %s742_s13 = scalar_lea.hbm %s991_s3, 1024 }
   0x2   :  { %s27_s10 = sshll.u32 %s790_s30, 4  ;;  %p743_p0 = scmp.ne.s32.totalorder %s991_s3, %s742_s13  ;;  %s28_s10 = int_to_ptr.vmem [resolvable:$true] %s27_s10 }
   0x3   :  { %p746_p1 = scmp.lt.u32.totalorder %s742_s13, %s991_s3 }
   0x5   :  { %p748_p2 = pnand %p746_p1, %p743_p0 }
   0x7   :  { %751 = shalt.err (!%p748_p2)
}
   0x8   :  { %s752_s18 = scalar_lea.vmem %s28_s10, 1024  ;;  %p757_p4 = scmp.lt.s32.totalorder %s28_s10, %s28_s10 }
   0x9   :  { %p753_p3 = scmp.ne.s32.totalorder %s28_s10, %s752_s18  ;;  %p758_p5 = scmp.lt.s32.totalorder %s752_s18, %s752_s18 }
   0xb   :  { %p759_p6 = por %p758_p5, %p757_p4 }
   0xd   :  { %p760_p7 = pnand %p759_p6, %p753_p3 }
   0xf   :  { %763 = shalt.err (!%p760_p7)
}
  0x10   :  { %s791_s19 = smov 64   ;;  %s792_s20 = smov 4  }
  0x11   :  { %33 = dma.hbm_to_vmem [thread:$0]  %s991_s3, 1024, %s28_s10, [#allocation3], %s791_s19, %s791_s19, %s792_s20  }
  0x12   :  { %786 = dma.done.wait [#allocation3], 1024  }
  0x13   :  { %787 = vsyncadd [#allocation3], 4294966272  ;;  %v793_v0 = vmov 0.0   ;;  %vm794_vm0 = vmmov 0   ;;  %v692_v1 = vld [vmem:[%s989_s1] sm:$0xff]   ;;  %v693_v2 = vld [vmem:[%s989_s1 + $0x8] sm:$0xff]   ;;  %v250_v62 = vlaneseq }
  0x14   :  { %657 = vmatprep.subr.bf16.mxu0 %v793_v0  ;;  %661 = vmatprep.mubr.msk.bf16.mxu0 %vm794_vm0, %v793_v0  ;;  %v48_v3 = vld [vmem:[%s988_s0] sm:$0x3]  ;;  %v695_v6 = vld [vmem:[#allocation2 + $0x8] sm:$0xff]   ;;  %vm73_vm1 = vcmask 261120   ;;  %v696_v7 = vld [vmem:[#allocation2 + $0x10] sm:$0xff]   ;;  %v795_v37 = vmov 0  }
  0x15   :  { %665 = vmatprep.subr.bf16.mxu1 %v793_v0  ;;  %681 = vmatprep.mubr.msk.bf16.mxu1 %vm794_vm0, %v793_v0  ;;  %v694_v4 = vld [vmem:[#allocation2] sm:$0xff]   ;;  %v49_v5 = vpack.c.bf16 %v48_v3, %v48_v3  ;;  %v697_v8 = vld [vmem:[#allocation2 + $0x18] sm:$0xff]   ;;  %v699_v10 = vld [vmem:[#allocation2 + $0x28] sm:$0xff]   ;;  %v251_v63 = vshrl.u32 %v250_v62, 7  ;;  %vm560_vm2 = vcmask 58368  }
  0x16   :  { %658 = vmatpush3.bf16.msra.mxu0 %v692_v1  ;;  %666 = vmatpush3.bf16.msra.mxu1 %v694_v4  ;;  %v698_v9 = vld [vmem:[#allocation2 + $0x20] sm:$0xff]   ;;  %v700_v11 = vld [vmem:[#allocation2 + $0x30] sm:$0xff]   ;;  %v701_v12 = vld [vmem:[#allocation2 + $0x38] sm:$0xff]  }
  0x17   :  { %659 = vmatprep.subr.bf16.mxu0 %v793_v0  ;;  %667 = vmatprep.subr.bf16.mxu1 %v793_v0  ;;  %v702_v13 = vld [vmem:[%s993_s5] ss:$8 sps:$4 sm:$0xff]   ;;  %v704_v14 = vld [vmem:[%s993_s5 + $0x4] ss:$8 sps:$4 sm:$0xff]   ;;  %v707_v15 = vld [vmem:[%s993_s5 + $0x14] ss:$8 sps:$4 sm:$0xff]  }
  0x18   :  { %v705_v16 = vld [vmem:[%s993_s5 + $0x10] ss:$8 sps:$4 sm:$0xff]   ;;  %v710_v17 = vld [vmem:[%s993_s5 + $0x24] ss:$8 sps:$4 sm:$0xff]   ;;  %v708_v18 = vld [vmem:[%s993_s5 + $0x20] ss:$8 sps:$4 sm:$0xff]  }
  0x19   :  { %v713_v19 = vld [vmem:[%s993_s5 + $0x34] ss:$8 sps:$4 sm:$0xff]   ;;  %v711_v20 = vld [vmem:[%s993_s5 + $0x30] ss:$8 sps:$4 sm:$0xff]   ;;  %v716_v21 = vld [vmem:[%s993_s5 + $0x44] ss:$8 sps:$4 sm:$0xff]  }
  0x1a   :  { %660 = vmatpush3.bf16.msra.mxu0 %v693_v2  ;;  %668 = vmatpush3.bf16.msra.mxu1 %v695_v6  ;;  %v714_v22 = vld [vmem:[%s993_s5 + $0x40] ss:$8 sps:$4 sm:$0xff]   ;;  %v719_v23 = vld [vmem:[%s993_s5 + $0x54] ss:$8 sps:$4 sm:$0xff]   ;;  %v717_v24 = vld [vmem:[%s993_s5 + $0x50] ss:$8 sps:$4 sm:$0xff]  }
  0x1b   :  { %669 = vmatprep.subr.bf16.mxu1 %v793_v0  ;;  %340 = vmatprep.subr.bf16.mxu0 %v704_v14  ;;  %v722_v25 = vld [vmem:[%s993_s5 + $0x64] ss:$8 sps:$4 sm:$0xff]   ;;  %v720_v26 = vld [vmem:[%s993_s5 + $0x60] ss:$8 sps:$4 sm:$0xff]   ;;  %v725_v35 = vld [vmem:[%s993_s5 + $0x74] ss:$8 sps:$4 sm:$0xff]  }
  0x1c   :  { %v577_v27 = vld [vmem:[%s990_s2] ss:$0 sm:$0xff]  ;;  %v723_v36 = vld [vmem:[%s993_s5 + $0x70] ss:$8 sps:$4 sm:$0xff]   ;;  %v728_v40 = vld [vmem:[%s995_s7 + $0x48] sm:$0xff]   ;;  %v256_v2 = vsub.s32 1, %v251_v63 }
  0x1d   :  { %662 = vmatmul.mubr.msk.bf16.vlgmr.msra.gmra.mrb[0].mxu0 %vm73_vm1, %v49_v5  ;;  %v726_v38 = vld [vmem:[%s995_s7 + $0x40] sm:$0xff]   ;;  %v729_v41 = vld [vmem:[%s995_s7 + $0x8] sm:$0xff]   ;;  %v730_v42 = vld [vmem:[%s995_s7 + $0x50] sm:$0xff]  }
  0x1e   :  { %670 = vmatpush3.bf16.msra.mxu1 %v696_v7  ;;  %341 = vmatpush1.bf16.msra.mxu0 %v702_v13  ;;  %v727_v39 = vld [vmem:[%s995_s7] sm:$0xff]   ;;  %v731_v43 = vld [vmem:[%s995_s7 + $0x10] sm:$0xff]   ;;  %v732_v44 = vld [vmem:[%s995_s7 + $0x58] sm:$0xff]  }
  0x1f   :  { %671 = vmatprep.subr.bf16.mxu1 %v793_v0  ;;  %342 = vmatprep.subr.bf16.mxu0 %v707_v15  ;;  %v733_v45 = vld [vmem:[%s995_s7 + $0x18] sm:$0xff]   ;;  %v734_v46 = vld [vmem:[%s995_s7 + $0x60] sm:$0xff]   ;;  %v736_v48 = vld [vmem:[%s995_s7 + $0x68] sm:$0xff]  }
  0x20   :  { %372 = vmatprep.mubr.bf16.mxu0 %v795_v37  ;;  %v735_v47 = vld [vmem:[%s995_s7 + $0x20] sm:$0xff]   ;;  %v737_v49 = vld [vmem:[%s995_s7 + $0x28] sm:$0xff]   ;;  %v738_v58 = vld [vmem:[%s995_s7 + $0x70] sm:$0xff]  }
  0x21   :  { %v581_v50 = vld [vmem:[%s992_s4] ss:$0 sm:$0xff]  ;;  %v739_v59 = vld [vmem:[%s995_s7 + $0x30] sm:$0xff]   ;;  %v740_v60 = vld [vmem:[%s995_s7 + $0x78] sm:$0xff]  }
  0x22   :  { %672 = vmatpush3.bf16.msra.mxu1 %v697_v8  ;;  %343 = vmatpush1.bf16.msra.mxu0 %v705_v16  ;;  %v741_v61 = vld [vmem:[%s995_s7 + $0x38] sm:$0xff]   ;;  %v248_v1 = vld [vmem:[%s994_s6] sm:$0x3]  ;;  %s796_s6 = smov [#allocation5]  }
  0x23   :  { %673 = vmatprep.subr.bf16.mxu1 %v793_v0  ;;  %344 = vmatprep.subr.bf16.mxu0 %v710_v17  ;;  %v257_v4 = vrot.slane %v248_v1, %v256_v2  ;;  %v606_v16 = vld [vmem:[%s996_s8] ss:$0 sm:$0xff]  ;;  %s568_s23 = sshll.u32 %s796_s6, 4  ;;  %s569_s23 = int_to_ptr.vmem [resolvable:$true] %s568_s23 }
  0x24   :  { %s764_s24 = scalar_lea.vmem %s569_s23, 32  ;;  %p769_p9 = scmp.lt.s32.totalorder %s569_s23, %s569_s23 }
  0x25   :  { %p765_p8 = scmp.ne.s32.totalorder %s569_s23, %s764_s24  ;;  %p770_p10 = scmp.lt.s32.totalorder %s764_s24, %s764_s24 }
  0x26   :  { %674 = vmatpush3.bf16.msra.mxu1 %v698_v9  ;;  %345 = vmatpush1.bf16.msra.mxu0 %v708_v18 }
  0x27   :  { %675 = vmatprep.subr.bf16.mxu1 %v793_v0  ;;  %346 = vmatprep.subr.bf16.mxu0 %v713_v19  ;;  %p771_p11 = por %p770_p10, %p769_p9 }
  0x29   :  { %p772_p12 = pnand %p771_p11, %p765_p8 }
  0x2a   :  { %676 = vmatpush3.bf16.msra.mxu1 %v699_v10  ;;  %347 = vmatpush1.bf16.msra.mxu0 %v711_v20 }
  0x2b   :  { %677 = vmatprep.subr.bf16.mxu1 %v793_v0  ;;  %348 = vmatprep.subr.bf16.mxu0 %v716_v21 }
  0x2e   :  { %678 = vmatpush3.bf16.msra.mxu1 %v700_v11  ;;  %349 = vmatpush1.bf16.msra.mxu0 %v714_v22 }
  0x2f   :  { %679 = vmatprep.subr.bf16.mxu1 %v793_v0  ;;  %350 = vmatprep.subr.bf16.mxu0 %v719_v23  ;;  %v252_v0 = vsub.s32 0, %v251_v63 }
  0x31   :  { %v253_v3 = vrot.slane %v248_v1, %v252_v0 }
  0x32   :  { %680 = vmatpush3.bf16.msra.mxu1 %v701_v12  ;;  %351 = vmatpush1.bf16.msra.mxu0 %v717_v24 }
  0x33   :  { %352 = vmatprep.subr.bf16.mxu0 %v722_v25  ;;  %635 = vmatprep.subr.bf16.mxu1 %v726_v38 }
  0x36   :  { %353 = vmatpush1.bf16.msra.mxu0 %v720_v26 }
  0x37   :  { %354 = vmatprep.subr.bf16.mxu0 %v725_v35 }
  0x3a   :  { %355 = vmatpush1.bf16.msra.mxu0 %v723_v36 }
  0xf0   :  { %v111_v28 = vpop.f32.mrb[0].mxu0 }
  0xf1   :  { %v112_v29 = vadd.f32 %v577_v27, %v111_v28  ;;  %v663_v30 = vpop.f32.mrb[1].mxu0 }
  0xf2   :  { %v114_v31 = vpop.f32.mrb[2].mxu0 }
  0xf3   :  { %v117_v32 = vmax.f32 %v112_v29, 0.0  ;;  %v664_v33 = vpop.f32.mrb[3].mxu0 }
  0xf5   :  { %v118_v34 = vpack.c.bf16 %v117_v32, %v117_v32 }
  0xf7   :  { %682 = vmatmul.mubr.bf16.vlgmr.msra.gmra.mrb[0].mxu1 %v118_v34 }
  0xf8   :  { %636 = vmatpush3.bf16.msra.mxu1 %v727_v39 }
  0xf9   :  { %637 = vmatprep.subr.bf16.mxu1 %v728_v40 }
  0xfc   :  { %638 = vmatpush3.bf16.msra.mxu1 %v729_v41 }
  0xfd   :  { %639 = vmatprep.subr.bf16.mxu1 %v730_v42 }
 0x100   :  { %640 = vmatpush3.bf16.msra.mxu1 %v731_v43 }
 0x101   :  { %641 = vmatprep.subr.bf16.mxu1 %v732_v44 }
 0x104   :  { %642 = vmatpush3.bf16.msra.mxu1 %v733_v45 }
 0x105   :  { %643 = vmatprep.subr.bf16.mxu1 %v734_v46 }
 0x108   :  { %644 = vmatpush3.bf16.msra.mxu1 %v735_v47 }
 0x109   :  { %645 = vmatprep.subr.bf16.mxu1 %v736_v48 }
 0x10c   :  { %646 = vmatpush3.bf16.msra.mxu1 %v737_v49 }
 0x10d   :  { %647 = vmatprep.subr.bf16.mxu1 %v738_v58 }
 0x110   :  { %648 = vmatpush3.bf16.msra.mxu1 %v739_v59 }
 0x111   :  { %649 = vmatprep.subr.bf16.mxu1 %v740_v60 }
 0x114   :  { %650 = vmatpush3.bf16.msra.mxu1 %v741_v61 }
 0x1ca   :  { %v224_v51 = vpop.f32.mrb[0].mxu1 }
 0x1cb   :  { %v225_v52 = vadd.f32 %v581_v50, %v224_v51  ;;  %v683_v53 = vpop.f32.mrb[1].mxu1 }
 0x1cc   :  { %v227_v54 = vpop.f32.mrb[2].mxu1 }
 0x1cd   :  { %v230_v55 = vmax.f32 %v225_v52, 0.0  ;;  %v684_v56 = vpop.f32.mrb[3].mxu1 }
 0x1cf   :  { %v231_v57 = vpack.c.bf16 %v230_v55, %v230_v55 }
 0x1d1   :  { %373 = vmatmul.mubr.bf16.vlgmr.msra.gmra.mrb[4].mxu0 %v231_v57 }
 0x2a4   :  { %v374_v5 = vpop.f32.mrb[4].mxu0 }
 0x2a5   :  { %v375_v6 = vadd.f32 %v374_v5, %v253_v3  ;;  %v376_v7 = vpop.f32.mrb[5].mxu0 }
 0x2a6   :  { %v377_v8 = vadd.f32 %v376_v7, %v257_v4  ;;  %v378_v9 = vpop.f32.mrb[6].mxu0 }
 0x2a7   :  { %v381_v10 = vmax.f32 %v375_v6, 0.0  ;;  %v379_v11 = vpop.f32.mrb[7].mxu0 }
 0x2a8   :  { %v382_v12 = vmax.f32 %v377_v8, 0.0 }
 0x2a9   :  { %v383_v14 = vpack.c.bf16 %v381_v10, %v381_v10 }
 0x2aa   :  { %v384_v13 = vpack.c.bf16 %v382_v12, %v382_v12 }
 0x2ac   :  { %552 = vmatprep.mubr.bf16.mxu1 %v384_v13 }
 0x2ad   :  { %553 = vmatmul.mubr.bf16.vlgmr.msra.gmra.mrb[4].mxu1 %v383_v14 }
 0x380   :  { %v651_v15 = vpop.f32.mrb[4].mxu1 }
 0x381   :  { %v652_v17 = vpop.f32.mrb[5].mxu1 }
 0x382   :  { %v653_v18 = vadd.f32 %v652_v17, %v651_v15  ;;  %v654_v19 = vpop.f32.mrb[6].mxu1 }
 0x383   :  { %v655_v20 = vpop.f32.mrb[7].mxu1 }
 0x384   :  { %v555_v21 = vadd.f32 %v653_v18, %v606_v16 }
 0x386   :  { %561 = vst.msk [vmem:[#allocation5] sm:$0x3] %vm560_vm2, %v555_v21 }
 0x387   :  { %775 = shalt.err (!%p772_p12)
}
 0x388   :  { %s776_s8 = scalar_lea.hbm %s997_s9, 32 }
 0x389   :  { %p777_p13 = scmp.ne.s32.totalorder %s997_s9, %s776_s8  ;;  %p780_p0 = scmp.lt.u32.totalorder %s776_s8, %s997_s9 }
 0x38b   :  { %p782_p1 = pnand %p780_p0, %p777_p13 }
 0x38d   :  { %785 = shalt.err (!%p782_p1)
}
 0x38e   :  { %571 = dma.vmem_to_hbm [thread:$0]  %s569_s23, 32, %s997_s9, [#allocation4]  }
 0x38f   :  { %788 = dma.done.wait [#allocation4], 32  }
 0x390   :  { %789 = vsyncadd [#allocation4], 4294967264 }
 0x391   :  { %575 = vsyncpa [#allocation3], 1 }
 0x392   :  { %576 = vsyncpa [#allocation4], 1 }

</bundles_post_ra>
